<compile_context>
chip_gen: v7x
topology: tpu7x:2x2x1
jax: 0.10.0
libtpu: 0.0.40
codegen_flags: <defaults>
</compile_context>

<pallas_src>
import functools

import numpy as np
import jax
import jax.numpy as jnp
from jax.experimental import pallas as pl
from jax.experimental.pallas import tpu as pltpu


def _round_up(n, m):
    return -(-n // m) * m


# ---------------------------- Pallas kernel ----------------------------

def _scconv_kernel(x_ref, mf_ref, mp_ref, at_ref, ut_ref,
                   w2_ref, b2_ref, w3_ref, b3_ref, w4_ref, b4_ref,
                   o_ref, *, W, Wp, roll_forward):
    x = x_ref[...].astype(jnp.float32)                       # (Cp, HWf)

    def conv3x3(v, width, m_ref, w_ref, b_ref):
        # v: (Cp, P) f32.  m_ref: (9, 1, P) 0/1 masks.  w_ref: (Cp, 9*Cp) bf16.
        # Builds shifted_t[:, p] = v[:, p + dy*width + dx] (zero outside the image)
        # with XLU lane rolls, stacks the 9 taps on sublanes, one MXU matmul.
        P = v.shape[-1]
        parts = []
        for t in range(9):
            dy, dx = t // 3 - 1, t % 3 - 1
            d = dy * width + dx
            s = ((-d) if roll_forward else d) % P
            vs = pltpu.roll(v, s, axis=1) if s else v
            parts.append(vs * m_ref[t])                      # zero wrapped rows/cols
        stack = jnp.concatenate(parts, axis=0).astype(jnp.bfloat16)   # (9*Cp, P)
        acc = jnp.dot(w_ref[...], stack, preferred_element_type=jnp.float32)
        return acc + b_ref[...]                              # (Cp, P) f32

    x_bf = x.astype(jnp.bfloat16)

    # k2 branch: AvgPool2d(r, r) -> Conv3x3 -> ReLU -> nearest upsample to (H, W).
    pooled = jnp.dot(x_bf, at_ref[...], preferred_element_type=jnp.float32)   # (Cp, HWq)
    k2 = jnp.maximum(conv3x3(pooled, Wp, mp_ref, w2_ref, b2_ref), 0.0)
    up = jnp.dot(k2.astype(jnp.bfloat16), ut_ref[...],
                 preferred_element_type=jnp.float32)                          # (Cp, HWf)

    # out = sigmoid(identity + interpolate(k2(x)) + 1e-8)
    gate = jax.nn.sigmoid(x + up + 1e-8)

    # k3 branch: Conv3x3 -> ReLU, gated, then k4: Conv3x3 -> ReLU.
    k3 = jnp.maximum(conv3x3(x, W, mf_ref, w3_ref, b3_ref), 0.0)
    out = jnp.maximum(conv3x3(k3 * gate, W, mf_ref, w4_ref, b4_ref), 0.0)
    o_ref[...] = out.astype(o_ref.dtype)


# ------------------- constant construction (plain numpy glue) -------------------

def _tap_masks(H, W, P_pad):
    """(9, 1, P_pad) 0/1 masks: tap t=(ky*3+kx) is valid at flat p=(i, j) iff
    (i+ky-1, j+kx-1) lies inside the (H, W) image (zero padding elsewhere)."""
    m = np.zeros((9, 1, P_pad), np.float32)
    for t in range(9):
        dy, dx = t // 3 - 1, t % 3 - 1
        for i in range(H):
            if not 0 <= i + dy < H:
                continue
            for j in range(W):
                if 0 <= j + dx < W:
                    m[t, 0, i * W + j] = 1.0
    return m


def _pool_matrix_t(H, W, r, P_pad, Q_pad):
    """Right-multiply AvgPool2d(r, r): x_flat (HW) @ A -> pooled_flat (HWp)."""
    Wp = W // r
    A = np.zeros((P_pad, Q_pad), np.float32)
    inv = 1.0 / (r * r)
    for i in range(H):
        for j in range(W):
            A[i * W + j, (i // r) * Wp + (j // r)] = inv
    return A


def _upsample_matrix_t(H, W, r, Q_pad, P_pad):
    """Right-multiply nearest upsample: pooled_flat (HWp) @ U -> full-res (HW)."""
    Wp = W // r
    U = np.zeros((Q_pad, P_pad), np.float32)
    for i in range(H):
        for j in range(W):
            U[(i // r) * Wp + (j // r), i * W + j] = 1.0
    return U


def _vmem_bytes(shape, dtype):
    s = list(shape)
    s[-1] = _round_up(s[-1], 128)
    if len(s) >= 2:
        s[-2] = _round_up(s[-2], 8)
    return int(np.prod(s)) * np.dtype(dtype).itemsize


@functools.lru_cache(maxsize=None)
def _roll_is_forward():
    """Pin the rotate direction of pltpu.roll with a tiny probe kernel
    (True => jnp.roll semantics: result[:, p] = x[:, p - shift])."""
    def k(x_ref, o_ref):
        o_ref[...] = pltpu.roll(x_ref[...], 1, axis=1)
    x = jnp.arange(8 * 256, dtype=jnp.float32).reshape(8, 256)
    y = pl.pallas_call(k, out_shape=jax.ShapeDtypeStruct((8, 256), jnp.float32))(x)
    return bool(y[0, 0] == x[0, -1])


# ---------- wrapper ----------

def scconv_forward(x_nchw, params, pooling_r):
    N, C, H, W = x_nchw.shape
    r = pooling_r
    assert H % r == 0 and W % r == 0, "pool/upsample path assumes H, W divisible by pooling_r"
    Hp, Wp = H // r, W // r
    HW, HWp = H * W, Hp * Wp
    HWf = _round_up(HW, 128)          # lane-dense full-res spatial extent
    HWq = _round_up(HWp, 128)         # lane-dense pooled spatial extent

    w2, b2, w3, b3, w4, b4 = params   # w*: (9, Cin, Cout) tap-major, b*: (1, Cout)
    assert w2.shape[1] == C and w2.shape[2] == C, "residual add requires Cin == Cout"
    Cp = _round_up(C, 8)              # channels live on sublanes

    # NCHW -> (N, Cp, HWf): channels on sublanes, flat row-major spatial on lanes.
    xf = x_nchw.reshape(N, C, HW)
    xf = jnp.pad(xf, ((0, 0), (0, Cp - C), (0, HWf - HW)))

    MF = jnp.asarray(_tap_masks(H, W, HWf))                       # (9, 1, HWf)
    MP = jnp.asarray(_tap_masks(Hp, Wp, HWq))                     # (9, 1, HWq)
    AT = jnp.asarray(_pool_matrix_t(H, W, r, HWf, HWq)).astype(jnp.bfloat16)
    UT = jnp.asarray(_upsample_matrix_t(H, W, r, HWq, HWf)).astype(jnp.bfloat16)

    def prep(w_taps, b):
        # Fuse the 9 taps: w_mat[co, t*Cp + ci] = w_taps[t, ci, co]  (bf16 for the MXU).
        wp = jnp.zeros((9, Cp, Cp), jnp.float32).at[:, :C, :C].set(w_taps)
        wm = jnp.transpose(wp, (2, 0, 1)).reshape(Cp, 9 * Cp).astype(jnp.bfloat16)
        bp = jnp.zeros((Cp, 1), jnp.float32).at[:C, 0].set(b.reshape(-1))
        return wm, bp

    w2m, b2m = prep(w2, b2)
    w3m, b3m = prep(w3, b3)
    w4m, b4m = prep(w4, b4)

    # Size the scoped VMEM limit to the actual working set (with headroom).
    consts = [MF, MP, AT, UT, w2m, b2m, w3m, b3m, w4m, b4m]
    const_bytes = sum(_vmem_bytes(a.shape, a.dtype) for a in consts)
    img_bytes = _vmem_bytes((Cp, HWf), np.float32)
    stack_bytes = _vmem_bytes((9 * Cp, HWf), np.float32)
    working_set = 2 * (const_bytes + 2 * img_bytes) + 2 * stack_bytes + 10 * img_bytes
    vmem_limit = int(min(100 * 1024 * 1024, max(32 * 1024 * 1024, 2 * working_set)))

    kernel = functools.partial(_scconv_kernel, W=W, Wp=Wp,
                               roll_forward=_roll_is_forward())

    def const(arr):
        nd = arr.ndim
        return pl.BlockSpec(arr.shape, lambda n, _nd=nd: (0,) * _nd)

    # TODO(synk): for v7x with N == 1, add a second "parallel" grid axis over spatial
    # row blocks (with 2-row halos) so both TensorCores get work.
    # TODO(synk): for production channel counts (>= 256), tile Cin/Cout over extra grid
    # axes with a pl.when-initialized accumulator instead of keeping all weights resident.
    out = pl.pallas_call(
        kernel,
        out_shape=jax.ShapeDtypeStruct((N, Cp, HWf), x_nchw.dtype),
        grid=(N,),
        in_specs=[
            pl.BlockSpec((None, Cp, HWf), lambda n: (n, 0, 0)),   # x, one batch element
            const(MF), const(MP), const(AT), const(UT),
            const(w2m), const(b2m), const(w3m), const(b3m), const(w4m), const(b4m),
        ],
        out_specs=pl.BlockSpec((None, Cp, HWf), lambda n: (n, 0, 0)),
        compiler_params=pltpu.CompilerParams(
            dimension_semantics=("parallel",),
            vmem_limit_bytes=vmem_limit),
    )(xf, MF, MP, AT, UT, w2m, b2m, w3m, b3m, w4m, b4m)

    # (N, Cp, HWf) -> NCHW, dropping channel / lane padding.
    return out[:, :C, :HW].reshape(N, C, H, W)


# ---------- pure-JAX reference (for correctness check only) ----------

def scconv_reference(x_nchw, w2, b2, w3, b3, w4, b4, r):
    x = jnp.transpose(x_nchw, (0, 2, 3, 1))
    N, H, W, C = x.shape

    def conv(v, w_taps, b):
        w_hwio = w_taps.reshape(3, 3, w_taps.shape[1], w_taps.shape[2])
        y = jax.lax.conv_general_dilated(
            v, w_hwio, (1, 1), "SAME",
            dimension_numbers=("NHWC", "HWIO", "NHWC"))
        return y + b.reshape(1, 1, 1, -1)

    pooled = x.reshape(N, H // r, r, W // r, r, C).mean(axis=(2, 4))
    k2 = jax.nn.relu(conv(pooled, w2, b2))
    up = jnp.repeat(jnp.repeat(k2, r, axis=1), r, axis=2)      # nearest upsample
    gate = jax.nn.sigmoid(x + up + 1e-8)
    k3 = jax.nn.relu(conv(x, w3, b3))
    out = jax.nn.relu(conv(k3 * gate, w4, b4))
    return jnp.transpose(out, (0, 3, 1, 2))


if __name__ == "__main__":
    N, C, H, W = 2, 4, 16, 16      # input_channels == output_channels (required by residual add)
    pooling_r = 4

    key = jax.random.PRNGKey(0)
    kx, k2w, k3w, k4w = jax.random.split(key, 4)
    x = jax.random.normal(kx, (N, C, H, W), jnp.float32)

    def conv_params(kk, cin, cout):
        # deterministic synthetic init; w_taps[ky*3+kx, ci, co] <-> torch weight[co, ci, ky, kx]
        kw, kb = jax.random.split(kk)
        w = 0.1 * jax.random.normal(kw, (9, cin, cout), jnp.float32)
        b = 0.05 * jax.random.normal(kb, (1, cout), jnp.float32)
        return w, b

    w2, b2 = conv_params(k2w, C, C)
    w3, b3 = conv_params(k3w, C, C)
    w4, b4 = conv_params(k4w, C, C)

    out = scconv_forward(x, (w2, b2, w3, b3, w4, b4), pooling_r)
    out = jax.block_until_ready(out)

    ref = scconv_reference(x, w2, b2, w3, b3, w4, b4, pooling_r)
    # bf16 MXU operands (f32 accumulation) => slightly looser tolerance than pure f32.
    np.testing.assert_allclose(np.asarray(out), np.asarray(ref), rtol=2e-2, atol=2e-2)

    print("KERNEL_OK")
</pallas_src>

<mosaic_0001>
module attributes {stable_mosaic.version = 11 : i64} {
  func.func @k(%arg0: memref<8x256xf32, #tpu.memory_space<vmem>>, %arg1: memref<8x256xf32, #tpu.memory_space<vmem>>) attributes {dimension_semantics = [], scalar_prefetch = 0 : i64, scratch_operands = 0 : i64, tpu.core_type = #tpu.core_type<tc>} {
    %c0 = arith.constant 0 : index
    %c0_0 = arith.constant 0 : index
    %0 = vector.load %arg0[%c0, %c0_0] : memref<8x256xf32, #tpu.memory_space<vmem>>, vector<8x256xf32>
    %c1_i32 = arith.constant 1 : i32
    %1 = tpu.dynamic_rotate %0 by %c1_i32 dim 1 : vector<8x256xf32>, i32 -> vector<8x256xf32>
    %c0_1 = arith.constant 0 : index
    %c0_2 = arith.constant 0 : index
    %2 = vector.load %arg1[%c0_1, %c0_2] : memref<8x256xf32, #tpu.memory_space<vmem>>, vector<8x256xf32>
    tpu.vector_store %arg1[%c0_1, %c0_2], %1 {strides = array<i32>} : memref<8x256xf32, #tpu.memory_space<vmem>>, vector<8x256xf32>,
    return
  }
}

</mosaic_0001>

<bundles_post_ra>
// kernel: tpu_custom_call.1
= control target key start
LH: loop header
LB: loop body
LE: loop exit
PB: predicated region body
PF: predicated region fallthrough
CT: control target
= control target key end

     0   :  { %6 = vsyncpa [#allocation3], 0  ;;  %s137_s0 = inlined_call_operand.hbm [shape: f32[8,256], index: 0, kind: input, shape index: {}]   ;;  %s138_s1 = inlined_call_operand.hbm [shape: f32[8,256], index: 1, kind: output, shape index: {}]  }
   0x1   :  { %7 = vsyncpa [#allocation4], 0  ;;  %s100_s6 = smov [#allocation2]   ;;  %s52_s10 = scalar_lea.hbm %s137_s0, 256 }
   0x2   :  { %s14_s7 = sshll.u32 %s100_s6, 4  ;;  %p53_p0 = scmp.ne.s32.totalorder %s137_s0, %s52_s10  ;;  %s15_s7 = int_to_ptr.vmem [resolvable:$true] %s14_s7 }
   0x3   :  { %p56_p1 = scmp.lt.u32.totalorder %s52_s10, %s137_s0 }
   0x5   :  { %p58_p2 = pnand %p56_p1, %p53_p0 }
   0x7   :  { %61 = shalt.err (!%p58_p2)
}
   0x8   :  { %s62_s15 = scalar_lea.vmem %s15_s7, 256  ;;  %p67_p4 = scmp.lt.s32.totalorder %s15_s7, %s15_s7 }
   0x9   :  { %p63_p3 = scmp.ne.s32.totalorder %s15_s7, %s62_s15  ;;  %p68_p5 = scmp.lt.s32.totalorder %s62_s15, %s62_s15 }
   0xb   :  { %p69_p6 = por %p68_p5, %p67_p4 }
   0xd   :  { %p70_p7 = pnand %p69_p6, %p63_p3 }
   0xf   :  { %73 = shalt.err (!%p70_p7)
}
  0x10   :  { %17 = dma.hbm_to_vmem [thread:$0]  %s137_s0, 256, %s15_s7, [#allocation3]  }
  0x11   :  { %96 = dma.done.wait [#allocation3], 256  }
  0x12   :  { %97 = vsyncadd [#allocation3], 4294967040  ;;  %v21_v0 = vld [vmem:[#allocation2] sm:$0xff]  ;;  %s101_s18 = smov 1   ;;  %v22_v1 = vld [vmem:[#allocation2 + $0x8] sm:$0xff]  ;;  %v27_v2 = vlaneseq  ;;  %s102_s19 = smov [#allocation5]  }
  0x13   :  { %23 = vrot.lane.b32.xlu0 %v21_v0, %s101_s18  ;;  %s40_s20 = sshll.u32 %s102_s19, 4  ;;  %s41_s20 = int_to_ptr.vmem [resolvable:$true] %s40_s20 }
  0x14   :  { %v28_v3 = vand.u32 127, %v27_v2  ;;  %s74_s0 = scalar_lea.vmem %s41_s20, 256  ;;  %p79_p9 = scmp.lt.s32.totalorder %s41_s20, %s41_s20 }
  0x15   :  { %p75_p8 = scmp.ne.s32.totalorder %s41_s20, %s74_s0  ;;  %p80_p10 = scmp.lt.s32.totalorder %s74_s0, %s74_s0 }
  0x16   :  { %vm29_vm0 = vcmp.lt.s32.totalorder %v28_v3, 1 }
  0x17   :  { %25 = vrot.lane.b32.xlu0 %v22_v1, %s101_s18  ;;  %p81_p11 = por %p80_p10, %p79_p9 }
  0x19   :  { %p82_p12 = pnand %p81_p11, %p75_p8 }
  0x85   :  { %v24_v4 = vpop.permute.xlu0 %23 }
  0x89   :  { %v26_v5 = vpop.permute.xlu0 %25 }
  0x8a   :  { %v30_v6 = vsel %vm29_vm0, %v24_v4, %v26_v5  ;;  %v31_v7 = vsel %vm29_vm0, %v26_v5, %v24_v4 }
  0x8b   :  { %32 = vst [vmem:[#allocation5] sm:$0xff] %v31_v7  ;;  %33 = vst [vmem:[#allocation5 + $0x8] sm:$0xff] %v30_v6 }
  0x8c   :  { %85 = shalt.err (!%p82_p12)
}
  0x8d   :  { %s86_s23 = scalar_lea.hbm %s138_s1, 256 }
  0x8e   :  { %p87_p13 = scmp.ne.s32.totalorder %s138_s1, %s86_s23  ;;  %p90_p0 = scmp.lt.u32.totalorder %s86_s23, %s138_s1 }
  0x90   :  { %p92_p1 = pnand %p90_p0, %p87_p13 }
  0x92   :  { %95 = shalt.err (!%p92_p1)
}
  0x93   :  { %43 = dma.vmem_to_hbm [thread:$0]  %s41_s20, 256, %s138_s1, [#allocation4]  }
  0x94   :  { %98 = dma.done.wait [#allocation4], 256  }
  0x95   :  { %99 = vsyncadd [#allocation4], 4294967040 }
  0x96   :  { %47 = vsyncpa [#allocation3], 1 }
  0x97   :  { %48 = vsyncpa [#allocation4], 1 }

</bundles_post_ra>
